<compile_context>
chip_gen: v6e
topology: v6e:2x2x1
jax: 0.10.0
libtpu: 0.0.40
codegen_flags: <defaults>
</compile_context>

<pallas_src>
import math
from typing import NamedTuple, Optional

import jax
import jax.numpy as jnp
from jax.experimental import pallas as pl
from jax.experimental.pallas import tpu as pltpu


# ------------------------------ hardware probing ------------------------------

def _device_kind() -> str:
    try:
        return jax.devices()[0].device_kind.lower()
    except Exception:
        return ""


def _physical_vmem_bytes() -> int:
    """Best-effort per-core VMEM capacity; conservative (v7x) fallback."""
    try:
        info = pltpu.get_tpu_info()
        for attr in ("vmem_capacity_bytes", "vmem_size_bytes"):
            v = getattr(info, attr, None)
            if v:
                return int(v)
    except Exception:
        pass
    kind = _device_kind()
    if "v5" in kind or "v6" in kind:
        return 128 * 1024 * 1024
    return 64 * 1024 * 1024  # v7x: 64 MiB per TensorCore


def _num_tensorcores_per_chip() -> int:
    kind = _device_kind()
    return 2 if ("v7" in kind or "7x" in kind) else 1


def _vmem_limit_bytes() -> int:
    # v5e/v6e -> 100 MiB, v7x -> 48 MiB.
    return min(_physical_vmem_bytes() - 16 * 1024 * 1024, 100 * 1024 * 1024)


# ------------------------------- tile selection --------------------------------

_TM_CAP = 512
_TN_CAP = 1024
_TK_CAP = 2048


def _round_up(x: int, m: int) -> int:
    return (x + m - 1) // m * m


def _pick_tile(dim: int, cap: int, quantum: int) -> int:
    """Largest tile <= cap that evenly covers round_up(dim, quantum) blocks."""
    padded = _round_up(max(int(dim), 1), quantum)
    if padded <= cap:
        return padded
    nblocks = math.ceil(padded / cap)
    return _round_up(math.ceil(padded / nblocks), quantum)


def _footprint_bytes(tm: int, tn: int, tk: int, out_bytes: int, w_bufs: int) -> int:
    """Double-buffered VMEM footprint of one kernel instance."""
    x = 2 * tm * tk * 2          # bf16 x tiles
    w = w_bufs * tk * tn * 2     # bf16 W tiles
    b = 2 * tn * 4               # f32 bias tile
    o = 2 * tm * tn * out_bytes  # output tiles
    acc = tm * tn * 4            # f32 accumulator scratch
    return x + w + b + o + acc


# ------------------------------ parameter prep ---------------------------------

class MLPParams(NamedTuple):
    w_p: jax.Array      # (Kp, Np) bf16, zero-padded to tile multiples
    b_p: jax.Array      # (1, Np)  f32, zero-padded
    d_in: int
    d_out: int
    tn: int
    tk: int
    deep_w_buffer: bool


def prepare_params(weight, bias, *, tn: Optional[int] = None,
                   tk: Optional[int] = None, batch_hint: int = 128) -> MLPParams:
    """Hoisted (once-per-layer) bf16 cast + pad of W/b, and N/K tile choice."""
    d_in, d_out = int(weight.shape[0]), int(weight.shape[1])

    auto_tn = tn is None
    tn = int(tn) if tn is not None else _pick_tile(d_out, _TN_CAP, 128)
    tk = int(tk) if tk is not None else _pick_tile(d_in, _TK_CAP, 128)

    # Megacore (v7x): if a typical forward would give a (1, 1, K) grid, split N
    # so both TensorCores get work.  No-op on single-core chips.
    if auto_tn and _num_tensorcores_per_chip() >= 2:
        tm_guess = min(_TM_CAP, _round_up(max(int(batch_hint), 1), 16))
        if _round_up(max(int(batch_hint), 1), tm_guess) // tm_guess <= 1:
            if tn // 2 >= 128 and d_out > tn // 2:
                tn //= 2

    kp = _round_up(d_in, tk)
    np_ = _round_up(d_out, tn)

    w_bf16 = weight.astype(jnp.bfloat16)
    if (kp, np_) != (d_in, d_out):
        w_p = jnp.zeros((kp, np_), jnp.bfloat16).at[:d_in, :d_out].set(w_bf16)
    else:
        w_p = w_bf16

    b_f32 = bias.astype(jnp.float32).reshape(1, d_out)
    if np_ != d_out:
        b_p = jnp.zeros((1, np_), jnp.float32).at[:, :d_out].set(b_f32)
    else:
        b_p = b_f32

    deep_w = "v5" in _device_kind()  # deeper W prefetch only on bandwidth-poor v5e
    return MLPParams(w_p, b_p, d_in, d_out, tn, tk, deep_w)


# ----------------------------------- kernel ------------------------------------

def _mlp_kernel(x_ref, w_ref, b_ref, o_ref, acc_ref):
    k = pl.program_id(2)

    # bf16 x bf16 -> f32 accumulation on the MXU.
    partial_ = jnp.dot(x_ref[...], w_ref[...], preferred_element_type=jnp.float32)

    @pl.when(k == 0)
    def _():
        acc_ref[...] = partial_          # direct store: skip the zero-init pass

    @pl.when(k > 0)
    def _():
        acc_ref[...] += partial_

    # Bias + ReLU epilogue only once, at the final K step.
    @pl.when(k == pl.num_programs(2) - 1)
    def _():
        o_ref[...] = jnp.maximum(acc_ref[...] + b_ref[...], 0.0).astype(o_ref.dtype)


# ---------------------------------- forward ------------------------------------

def mlp_forward(features, params: MLPParams, *, tm: Optional[int] = None,
                out_dtype=None):
    """features: (B, D_in); returns relu(features @ W + b) of shape (B, D_out)."""
    B, d_in = features.shape
    assert d_in == params.d_in, (d_in, params.d_in)
    d_out, tn, tk = params.d_out, params.tn, params.tk
    kp, np_ = params.w_p.shape

    out_dtype = out_dtype if out_dtype is not None else features.dtype
    out_bytes = jnp.dtype(out_dtype).itemsize

    auto_tm = tm is None
    tm = int(tm) if tm is not None else _pick_tile(B, _TM_CAP, 16)
    mp = _round_up(B, tm)

    # Megacore (v7x): if N has a single block and M would too, split M.
    if (auto_tm and _num_tensorcores_per_chip() >= 2 and np_ // tn <= 1
            and mp // tm <= 1 and tm // 2 >= 16 and B > tm // 2):
        tm //= 2
        mp = _round_up(B, tm)

    # Keep the double-buffered footprint within the per-generation VMEM budget.
    budget = int(0.9 * _vmem_limit_bytes())
    w_bufs = 3 if params.deep_w_buffer else 2
    while _footprint_bytes(tm, tn, tk, out_bytes, w_bufs) > budget and tm > 16:
        tm = max(16, tm // 2)
        mp = _round_up(B, tm)

    # Activation cast (bf16 MXU operand); pad only when not tile-aligned.
    x_bf16 = features.astype(jnp.bfloat16)
    if (mp, kp) != (B, d_in):
        x_p = jnp.zeros((mp, kp), jnp.bfloat16).at[:B, :d_in].set(x_bf16)
    else:
        x_p = x_bf16

    grid = (mp // tm, np_ // tn, kp // tk)

    def w_spec(deep):
        idx = lambda i, j, k: (k, j)
        if deep:
            try:
                return pl.BlockSpec((tk, tn), idx, pipeline_mode=pl.Buffered(3))
            except Exception:
                pass
        return pl.BlockSpec((tk, tn), idx)

    def run(deep):
        return pl.pallas_call(
            _mlp_kernel,
            out_shape=jax.ShapeDtypeStruct((mp, np_), out_dtype),
            grid=grid,
            in_specs=[
                pl.BlockSpec((tm, tk), lambda i, j, k: (i, k)),   # x tile
                w_spec(deep),                                     # W tile
                pl.BlockSpec((1, tn), lambda i, j, k: (0, j)),    # bias tile
            ],
            out_specs=pl.BlockSpec((tm, tn), lambda i, j, k: (i, j)),
            scratch_shapes=[pltpu.VMEM((tm, tn), jnp.float32)],
            compiler_params=pltpu.CompilerParams(
                dimension_semantics=("parallel", "parallel", "arbitrary"),
                vmem_limit_bytes=_vmem_limit_bytes(),
            ),
            cost_estimate=pl.CostEstimate(
                flops=2 * mp * kp * np_,
                transcendentals=0,
                bytes_accessed=(mp * kp * 2) * grid[1]       # x re-read per N block
                               + (kp * np_ * 2) * grid[0]    # W re-read per M block
                               + (np_ * 4) * grid[0]         # bias
                               + mp * np_ * out_bytes,       # output writeback
            ),
        )(x_p, params.w_p, params.b_p)

    if params.deep_w_buffer:
        try:
            out_padded = run(True)
        except Exception:          # safe fallback if deep buffering is unsupported
            out_padded = run(False)
    else:
        out_padded = run(False)

    if (mp, np_) != (B, d_out):
        return out_padded[:B, :d_out]
    return out_padded


def mlp_forward_dense(features, weight, bias, **kw):
    """One-shot convenience.  Prefer prepare_params() + mlp_forward() so the
    weight cast/pad is hoisted out of the per-call path."""
    return mlp_forward(
        features, prepare_params(weight, bias, batch_hint=features.shape[0]), **kw)


def init_params(key, input_dim, output_dim):
    """Deterministic parameter init (xavier-uniform-like W, uniform b)."""
    kw, kb = jax.random.split(key)
    limit = (6.0 / (input_dim + output_dim)) ** 0.5
    # stored as (input_dim, output_dim) == PyTorch weight.T
    weight = jax.random.uniform(kw, (input_dim, output_dim), jnp.float32,
                                minval=-limit, maxval=limit)
    b_lim = 1.0 / (input_dim ** 0.5)
    bias = jax.random.uniform(kb, (output_dim,), jnp.float32,
                              minval=-b_lim, maxval=b_lim)
    return weight, bias


if __name__ == "__main__":
    key = jax.random.PRNGKey(0)
    k_x, k_p, k_x2, k_p2 = jax.random.split(key, 4)

    # ---- case 1: the module's nominal small shapes ---------------------------
    batch, input_dim, output_dim = 8, 32, 16
    features = jax.random.normal(k_x, (batch, input_dim), jnp.float32)
    weight, bias = init_params(k_p, input_dim, output_dim)

    params = prepare_params(weight, bias, batch_hint=batch)   # hoisted cast/pad
    out = jax.block_until_ready(mlp_forward(features, params))

    # Reference with the same bf16 operand quantization (f32 accumulate).
    ref = jnp.maximum(
        features.astype(jnp.bfloat16).astype(jnp.float32)
        @ weight.astype(jnp.bfloat16).astype(jnp.float32) + bias, 0.0)
    assert out.shape == (batch, output_dim)
    assert jnp.allclose(out, ref, atol=1e-4, rtol=1e-4), (
        float(jnp.max(jnp.abs(out - ref))))
    # Sanity vs full-f32 math (bf16 input rounding only).
    ref_f32 = jnp.maximum(features @ weight + bias, 0.0)
    assert jnp.allclose(out, ref_f32, atol=5e-2, rtol=5e-2)

    # ---- case 2: small explicit tiles to exercise the multi-block K path -----
    b2, d_in2, d_out2 = 96, 256, 256
    f2 = jax.random.normal(k_x2, (b2, d_in2), jnp.float32)
    w2, bi2 = init_params(k_p2, d_in2, d_out2)
    p2 = prepare_params(w2, bi2, tn=128, tk=128, batch_hint=b2)
    o2 = jax.block_until_ready(mlp_forward(f2, p2, tm=32))    # grid (3, 2, 2)
    r2 = jnp.maximum(
        f2.astype(jnp.bfloat16).astype(jnp.float32)
        @ w2.astype(jnp.bfloat16).astype(jnp.float32) + bi2, 0.0)
    assert o2.shape == (b2, d_out2)
    assert jnp.allclose(o2, r2, atol=2e-2, rtol=2e-2), (
        float(jnp.max(jnp.abs(o2 - r2))))

    print("KERNEL_OK")
</pallas_src>

<mosaic_0001>
module attributes {stable_mosaic.version = 11 : i64} {
  func.func @_mlp_kernel(%arg0: i32, %arg1: i32, %arg2: i32, %arg3: memref<16x128xbf16, #tpu.memory_space<vmem>>, %arg4: memref<128x128xbf16, #tpu.memory_space<vmem>>, %arg5: memref<1x128xf32, #tpu.memory_space<vmem>>, %arg6: memref<16x128xf32, #tpu.memory_space<vmem>>, %arg7: memref<16x128xf32, #tpu.memory_space<vmem>>) attributes {dimension_semantics = [#tpu.dimension_semantics<parallel>, #tpu.dimension_semantics<parallel>, #tpu.dimension_semantics<arbitrary>], iteration_bounds = array<i64: 1, 1, 1>, scalar_prefetch = 0 : i64, scratch_operands = 1 : i64, tpu.core_type = #tpu.core_type<tc>, window_params = [{transform_indices = @transform_0, window_bounds = array<i64: 16, 128>}, {transform_indices = @transform_1, window_bounds = array<i64: 128, 128>}, {transform_indices = @transform_2, window_bounds = array<i64: 1, 128>}, {transform_indices = @transform_3, window_bounds = array<i64: 16, 128>}]} {
    %c0 = arith.constant 0 : index
    %c0_0 = arith.constant 0 : index
    %0 = vector.load %arg3[%c0, %c0_0] : memref<16x128xbf16, #tpu.memory_space<vmem>>, vector<16x128xbf16>
    %c0_1 = arith.constant 0 : index
    %c0_2 = arith.constant 0 : index
    %1 = vector.load %arg4[%c0_1, %c0_2] : memref<128x128xbf16, #tpu.memory_space<vmem>>, vector<128x128xbf16>
    %cst = arith.constant dense<0.000000e+00> : vector<16x128xf32>
    %2 = tpu.matmul %0, %1, %cst {dimension_numbers = #tpu.dot_dimension_numbers<[1], [0], [0], [1], [0, 0, 1, 1], [], []>} : vector<16x128xbf16>, vector<128x128xbf16>, vector<16x128xf32> -> vector<16x128xf32>
    %c0_i32 = arith.constant 0 : i32
    %3 = arith.cmpi eq, %arg2, %c0_i32 : i32
    %4 = arith.extui %3 : i1 to i32
    %c0_i32_3 = arith.constant 0 : i32
    %5 = arith.cmpi ne, %4, %c0_i32_3 : i32
    scf.if %5 {
      %c0_8 = arith.constant 0 : index
      %c0_9 = arith.constant 0 : index
      %12 = vector.load %arg7[%c0_8, %c0_9] : memref<16x128xf32, #tpu.memory_space<vmem>>, vector<16x128xf32>
      tpu.vector_store %arg7[%c0_8, %c0_9], %2 {strides = array<i32>} : memref<16x128xf32, #tpu.memory_space<vmem>>, vector<16x128xf32>,
    } else {
    }
    %c0_i32_4 = arith.constant 0 : i32
    %6 = arith.cmpi sgt, %arg2, %c0_i32_4 : i32
    %7 = arith.extui %6 : i1 to i32
    %c0_i32_5 = arith.constant 0 : i32
    %8 = arith.cmpi ne, %7, %c0_i32_5 : i32
    scf.if %8 {
      %c0_8 = arith.constant 0 : index
      %c0_9 = arith.constant 0 : index
      %12 = vector.load %arg7[%c0_8, %c0_9] : memref<16x128xf32, #tpu.memory_space<vmem>>, vector<16x128xf32>
      %13 = arith.addf %12, %2 : vector<16x128xf32>
      %c0_10 = arith.constant 0 : index
      %c0_11 = arith.constant 0 : index
      %14 = vector.load %arg7[%c0_10, %c0_11] : memref<16x128xf32, #tpu.memory_space<vmem>>, vector<16x128xf32>
      tpu.vector_store %arg7[%c0_10, %c0_11], %13 {strides = array<i32>} : memref<16x128xf32, #tpu.memory_space<vmem>>, vector<16x128xf32>,
    } else {
    }
    %c0_i32_6 = arith.constant 0 : i32
    %9 = arith.cmpi eq, %arg2, %c0_i32_6 : i32
    %10 = arith.extui %9 : i1 to i32
    %c0_i32_7 = arith.constant 0 : i32
    %11 = arith.cmpi ne, %10, %c0_i32_7 : i32
    scf.if %11 {
      %c0_8 = arith.constant 0 : index
      %c0_9 = arith.constant 0 : index
      %12 = vector.load %arg7[%c0_8, %c0_9] : memref<16x128xf32, #tpu.memory_space<vmem>>, vector<16x128xf32>
      %c0_10 = arith.constant 0 : index
      %c0_11 = arith.constant 0 : index
      %13 = vector.load %arg5[%c0_10, %c0_11] : memref<1x128xf32, #tpu.memory_space<vmem>>, vector<1x128xf32>
      %14 = vector.broadcast %13 : vector<1x128xf32> to vector<16x128xf32>
      %15 = arith.addf %12, %14 : vector<16x128xf32>
      %cst_12 = arith.constant 0.000000e+00 : f32
      %16 = vector.broadcast %cst_12 : f32 to vector<16x128xf32>
      %17 = arith.maximumf %15, %16 : vector<16x128xf32>
      %c0_13 = arith.constant 0 : index
      %c0_14 = arith.constant 0 : index
      %18 = vector.load %arg6[%c0_13, %c0_14] : memref<16x128xf32, #tpu.memory_space<vmem>>, vector<16x128xf32>
      tpu.vector_store %arg6[%c0_13, %c0_14], %17 {strides = array<i32>} : memref<16x128xf32, #tpu.memory_space<vmem>>, vector<16x128xf32>,
    } else {
    }
    return
  }
  func.func @transform_0(%arg0: i32, %arg1: i32, %arg2: i32) -> (i32, i32) {
    %c0_i32 = arith.constant 0 : i32
    return %arg0, %arg2 : i32, i32
  }
  func.func @transform_1(%arg0: i32, %arg1: i32, %arg2: i32) -> (i32, i32) {
    %c0_i32 = arith.constant 0 : i32
    return %arg2, %arg1 : i32, i32
  }
  func.func @transform_2(%arg0: i32, %arg1: i32, %arg2: i32) -> (i32, i32) {
    %c0_i32 = arith.constant 0 : i32
    %c0_i32_0 = arith.constant 0 : i32
    return %c0_i32, %arg1 : i32, i32
  }
  func.func @transform_3(%arg0: i32, %arg1: i32, %arg2: i32) -> (i32, i32) {
    %c0_i32 = arith.constant 0 : i32
    return %arg0, %arg1 : i32, i32
  }
}

</mosaic_0001>

<bundles_post_ra>
// kernel: tpu_custom_call.1
= control target key start
LH: loop header
LB: loop body
LE: loop exit
PB: predicated region body
PF: predicated region fallthrough
CT: control target
= control target key end

     0   :  { %8 = vsyncpa [#allocation4], 0  ;;  %s373_s0 = inlined_call_operand.hbm [shape: bf16[16,128], index: 0, kind: input, shape index: {}]   ;;  %s374_s1 = inlined_call_operand.hbm [shape: bf16[128,128], index: 1, kind: input, shape index: {}]   ;;  %s375_s2 = inlined_call_operand.vmem [shape: f32[1,128], index: 2, kind: input, shape index: {}]   ;;  %s376_s3 = inlined_call_operand.hbm [shape: f32[16,128], index: 3, kind: output, shape index: {}]  }
   0x1   :  { %9 = vsyncpa [#allocation7], 0 }
   0x2   :  { %10 = vsyncpa [#allocation5], 0  ;;  %s332_s12 = smov [#allocation3]  }
   0x3   :  { %s16_s13 = sshll.u32 %s332_s12, 4  ;;  %s17_s13 = int_to_ptr.vmem [resolvable:$true] %s16_s13 }
   0x4   :  { %s274_s14 = scalar_lea.vmem %s17_s13, 128  ;;  %p279_p1 = scmp.lt.s32.totalorder %s17_s13, %s17_s13 }
   0x5   :  { %p275_p0 = scmp.ne.s32.totalorder %s17_s13, %s274_s14  ;;  %p280_p2 = scmp.lt.s32.totalorder %s274_s14, %s274_s14 }
   0x7   :  { %p281_p3 = por %p280_p2, %p279_p1 }
   0x9   :  { %p282_p4 = pnand %p281_p3, %p275_p0 }
   0xb   :  { %285 = shalt.err (!%p282_p4)
}
   0xc   :  { %s333_s15 = smov 64   ;;  %s334_s16 = smov 4  }
   0xd   :  { %22 = dma.hbm_to_vmem [thread:$0]  %s373_s0, 128, %s17_s13, [#allocation4], %s333_s15, %s333_s15, %s334_s16  }
   0xe   :  { %s335_s19 = smov [#allocation6]  }
   0xf   :  { %s28_s20 = sshll.u32 %s335_s19, 4  ;;  %s29_s20 = int_to_ptr.vmem [resolvable:$true] %s28_s20 }
  0x10   :  { %s294_s21 = scalar_lea.vmem %s29_s20, 1024  ;;  %p299_p6 = scmp.lt.s32.totalorder %s29_s20, %s29_s20 }
  0x11   :  { %p295_p5 = scmp.ne.s32.totalorder %s29_s20, %s294_s21  ;;  %p300_p7 = scmp.lt.s32.totalorder %s294_s21, %s294_s21 }
  0x13   :  { %p301_p8 = por %p300_p7, %p299_p6 }
  0x15   :  { %p302_p9 = pnand %p301_p8, %p295_p5 }
  0x17   :  { %305 = shalt.err (!%p302_p9)
}
  0x18   :  { %34 = dma.hbm_to_vmem [thread:$0]  %s374_s1, 1024, %s29_s20, [#allocation7], %s333_s15, %s333_s15, %s334_s16  }
  0x19   :  { %326 = dma.done.wait [#allocation4], 128  }
  0x1a   :  { %327 = vsyncadd [#allocation4], 4294967168 }
  0x1b   :  { %328 = dma.done.wait [#allocation7], 1024  }
  0x1c   :  { %329 = vsyncadd [#allocation7], 4294966272  ;;  %v336_v0 = vmov 0.0   ;;  %vm337_vm0 = vmmov 0   ;;  %v257_v1 = vld [vmem:[#allocation6 + $0x38] sm:$0xff]   ;;  %v258_v2 = vld [vmem:[#allocation6 + $0x30] sm:$0xff]  }
  0x1d   :  { %228 = vmatprep.subr.bf16.mxu0 %v336_v0  ;;  %244 = vmatprep.mubr.msk.bf16.mxu0 %vm337_vm0, %v336_v0  ;;  %v259_v3 = vld [vmem:[#allocation6 + $0x28] sm:$0xff]   ;;  %v260_v4 = vld [vmem:[#allocation6 + $0x20] sm:$0xff]   ;;  %v261_v5 = vld [vmem:[#allocation6 + $0x18] sm:$0xff]   ;;  %s338_s24 = smov [#allocation8]  }
  0x1e   :  { %229 = vmatpush3.bf16.msra.mxu0 %v257_v1  ;;  %v262_v6 = vld [vmem:[#allocation6 + $0x10] sm:$0xff]   ;;  %v263_v7 = vld [vmem:[#allocation6 + $0x8] sm:$0xff]   ;;  %v264_v8 = vld [vmem:[#allocation6] sm:$0xff]   ;;  %s196_s25 = sshll.u32 %s338_s24, 4  ;;  %s197_s25 = int_to_ptr.vmem [resolvable:$true] %s196_s25 }
  0x1f   :  { %230 = vmatprep.subr.bf16.mxu0 %v336_v0  ;;  %v265_v9 = vld [vmem:[#allocation3] sm:$0xff]   ;;  %s306_s26 = scalar_lea.vmem %s197_s25, 256  ;;  %p311_p11 = scmp.lt.s32.totalorder %s197_s25, %s197_s25 }
  0x20   :  { %v218_v10 = vld [vmem:[%s375_s2] ss:$0 sm:$0xff]  ;;  %p307_p10 = scmp.ne.s32.totalorder %s197_s25, %s306_s26  ;;  %p312_p12 = scmp.lt.s32.totalorder %s306_s26, %s306_s26 }
  0x22   :  { %231 = vmatpush3.bf16.msra.mxu0 %v258_v2  ;;  %p313_p13 = por %p312_p12, %p311_p11 }
  0x23   :  { %232 = vmatprep.subr.bf16.mxu0 %v336_v0 }
  0x24   :  { %p314_p0 = pnand %p313_p13, %p307_p10 }
  0x26   :  { %233 = vmatpush3.bf16.msra.mxu0 %v259_v3 }
  0x27   :  { %234 = vmatprep.subr.bf16.mxu0 %v336_v0 }
  0x2a   :  { %235 = vmatpush3.bf16.msra.mxu0 %v260_v4 }
  0x2b   :  { %236 = vmatprep.subr.bf16.mxu0 %v336_v0 }
  0x2e   :  { %237 = vmatpush3.bf16.msra.mxu0 %v261_v5 }
  0x2f   :  { %238 = vmatprep.subr.bf16.mxu0 %v336_v0 }
  0x32   :  { %239 = vmatpush3.bf16.msra.mxu0 %v262_v6 }
  0x33   :  { %240 = vmatprep.subr.bf16.mxu0 %v336_v0 }
  0x36   :  { %241 = vmatpush3.bf16.msra.mxu0 %v263_v7 }
  0x37   :  { %242 = vmatprep.subr.bf16.mxu0 %v336_v0 }
  0x3a   :  { %243 = vmatpush3.bf16.msra.mxu0 %v264_v8 }
  0x3d   :  { %245 = vmatmul.mubr.bf16.vlgmr.msra.gmra.mxu0 %v265_v9 }
  0xfd   :  { %v150_v11 = vpop.f32.mrf.mxu0 }
  0xfe   :  { %v185_v12 = vadd.f32 %v218_v10, %v150_v11 }
  0xff   :  { %v246_v13 = vpop.f32.mrf.mxu0 }
 0x100   :  { %v187_v14 = vmax.f32 %v185_v12, 0.0 }
 0x101   :  { %v153_v15 = vpop.f32.mrf.mxu0 }
 0x102   :  { %189 = vst [vmem:[#allocation8] sm:$0xff] %v187_v14  ;;  %v186_v16 = vadd.f32 %v218_v10, %v153_v15 }
 0x103   :  { %v247_v17 = vpop.f32.mrf.mxu0 }
 0x104   :  { %v188_v18 = vmax.f32 %v186_v16, 0.0 }
 0x106   :  { %190 = vst [vmem:[#allocation8 + $0x8] sm:$0xff] %v188_v18 }
 0x107   :  { %317 = shalt.err (!%p314_p0)
}
 0x108   :  { %s339_s2 = smov 128   ;;  %s340_s27 = smov 8  }
 0x109   :  { %202 = dma.vmem_to_hbm [thread:$0]  %s197_s25, 256, %s376_s3, [#allocation5], %s339_s2, %s339_s2, %s340_s27  }
 0x10a   :  { %330 = dma.done.wait [#allocation5], 256  }
 0x10b   :  { %331 = vsyncadd [#allocation5], 4294967040 }
 0x10c   :  { %206 = vsyncpa [#allocation4], 1 }
 0x10d   :  { %207 = vsyncpa [#allocation7], 1 }
 0x10e   :  { %208 = vsyncpa [#allocation5], 1 }

</bundles_post_ra>
